<compile_context>
chip_gen: v7x
topology: tpu7x:2x2x1
jax: 0.10.0
libtpu: 0.0.40
codegen_flags: <defaults>
</compile_context>

<pallas_src>
import jax
import jax.numpy as jnp
from jax.experimental import pallas as pl
from jax.experimental.pallas import tpu as pltpu

NUM_CLASSES = 80
HEAD_DIM = 5 + NUM_CLASSES      # 85 raw head outputs: x, y, w, h, obj, cls_0..79
PADDED_DIM = 128                # lane-dense padded head width


def _yolor_addnms_kernel(x_ref, w_ref, b_ref, out_ref):
    # x_ref:   (1, C, N_TILE)   channel-major feature tile (straight from NCHW)
    # w_ref:   (C, 128)         folded + padded head weight
    #                           cols: 0-3 = x1,y1,x2,y2 ; 4 = obj ; 5-84 = cls ; 85-127 = 0
    # b_ref:   (1, 128)         folded + padded head bias
    # out_ref: (1, N_TILE, 128) cols: 0-3 bbox ; 4 obj ; 5-84 obj*cls ; 85-127 = 0
    x = x_ref[0]                 # (C, N_TILE)
    w = w_ref[...]               # (C, 128)

    # MXU matmul contracting over C (transposed-LHS form, handled natively).
    out = jax.lax.dot_general(
        x, w,
        dimension_numbers=(((0,), (0,)), ((), ())),
        preferred_element_type=jnp.float32,
    )                            # (N_TILE, 128)
    out = out + b_ref[...]       # broadcast (1, 128)

    # bbox columns 0-3 are already final (transform folded into W/b).
    # Only remaining vector work: scores = obj * cls on lanes >= 5.
    obj = out[:, 4:5]                                             # (N_TILE, 1)
    lane = jax.lax.broadcasted_iota(jnp.int32, out.shape, 1)      # (N_TILE, 128)
    out_ref[0] = jnp.where(lane >= 5, out * obj, out)


def _fold_head_params(w_head, b_head):
    """Fold xywh->x1y1x2y2 into the head weights/bias and pad to 128 columns."""
    C = w_head.shape[0]

    wx, wy, ww, wh = w_head[:, 0], w_head[:, 1], w_head[:, 2], w_head[:, 3]
    w_box = jnp.stack(
        [wx - 0.5 * ww, wy - 0.5 * wh, wx + 0.5 * ww, wy + 0.5 * wh], axis=1)
    w_folded = jnp.concatenate(
        [w_box, w_head[:, 4:],
         jnp.zeros((C, PADDED_DIM - HEAD_DIM), w_head.dtype)], axis=1)

    bx, by, bw, bh = b_head[:, 0], b_head[:, 1], b_head[:, 2], b_head[:, 3]
    b_box = jnp.stack(
        [bx - 0.5 * bw, by - 0.5 * bh, bx + 0.5 * bw, by + 0.5 * bh], axis=1)
    b_folded = jnp.concatenate(
        [b_box, b_head[:, 4:],
         jnp.zeros((1, PADDED_DIM - HEAD_DIM), b_head.dtype)], axis=1)

    return w_folded, b_folded


def yolor_add_nms(x_nchw, w_head, b_head, *, n_tile=128):
    """x_nchw: [B, C, H, W] f32 -> (bboxes [B, N, 1, 4], scores [B, N, 80])."""
    B, C, H, W = x_nchw.shape
    N = H * W
    assert N % n_tile == 0 and n_tile % 8 == 0, "n_tile must divide N, multiple of 8"

    # Free reshape (no transpose, no HBM round trip): NCHW -> [B, C, N].
    feats = x_nchw.reshape(B, C, N)

    w_folded, b_folded = _fold_head_params(w_head, b_head)

    combined = pl.pallas_call(
        _yolor_addnms_kernel,
        out_shape=jax.ShapeDtypeStruct((B, N, PADDED_DIM), jnp.float32),
        grid_spec=pltpu.PrefetchScalarGridSpec(
            num_scalar_prefetch=0,
            grid=(B, N // n_tile),
            in_specs=[
                # feats tile: channel-major, lane axis = anchors
                pl.BlockSpec((1, C, n_tile), lambda b, n: (b, 0, n)),
                # folded head weight / bias: resident (constant block index)
                pl.BlockSpec((C, PADDED_DIM), lambda b, n: (0, 0)),
                pl.BlockSpec((1, PADDED_DIM), lambda b, n: (0, 0)),
            ],
            out_specs=pl.BlockSpec(
                (1, n_tile, PADDED_DIM), lambda b, n: (b, n, 0)),
        ),
        compiler_params=pltpu.CompilerParams(
            dimension_semantics=("parallel", "parallel"),
            vmem_limit_bytes=32 * 1024 * 1024,   # safe on v7x (64 MiB VMEM/TC)
        ),
    )(feats, w_folded, b_folded)

    # Slice the lane-dense combined output back to the module's outputs.
    bboxes = combined[..., 0:4].reshape(B, N, 1, 4)   # == unsqueeze(2)
    scores = combined[..., 5:5 + NUM_CLASSES]
    return bboxes, scores


def _reference(x_nchw, w_head, b_head):
    """Pure-JAX reference mirroring the PyTorch module's recipe exactly."""
    B, C, H, W = x_nchw.shape
    N = H * W
    feats = x_nchw.reshape(B, C, N)
    out = jnp.einsum("bcn,cd->bnd", feats, w_head) + b_head[None]   # (B, N, 85)
    bx, by, bw, bh = out[..., 0:1], out[..., 1:2], out[..., 2:3], out[..., 3:4]
    bboxes = jnp.concatenate(
        [bx - bw / 2, by - bh / 2, bx + bw / 2, by + bh / 2], axis=-1)
    bboxes = bboxes[:, :, None, :]
    scores = out[..., 4:5] * out[..., 5:]
    return bboxes, scores


if __name__ == "__main__":
    key = jax.random.PRNGKey(0)
    k_x, k_w, k_b = jax.random.split(key, 3)

    B, C, H, W = 2, 32, 16, 16          # small NCHW conv-style input, N = 256
    x = jax.random.normal(k_x, (B, C, H, W), dtype=jnp.float32)
    # Deterministic synthetic detection-head parameters (the "model").
    # TODO(synk): the real YOLOR backbone/head is an arbitrary nn.Module; it is
    # represented here by a single per-anchor linear projection C -> 85.
    w_head = jax.random.normal(k_w, (C, HEAD_DIM), dtype=jnp.float32) * 0.1
    b_head = jax.random.normal(k_b, (1, HEAD_DIM), dtype=jnp.float32) * 0.1

    bboxes, scores = yolor_add_nms(x, w_head, b_head)
    jax.block_until_ready((bboxes, scores))

    ref_bboxes, ref_scores = _reference(x, w_head, b_head)
    assert bboxes.shape == (B, H * W, 1, 4)
    assert scores.shape == (B, H * W, NUM_CLASSES)
    # Tolerance covers MXU f32-pass rounding differences between the folded
    # weight columns (kernel) and the post-matmul transform (reference).
    assert jnp.allclose(bboxes, ref_bboxes, atol=2e-2, rtol=2e-2)
    assert jnp.allclose(scores, ref_scores, atol=2e-2, rtol=2e-2)

    print("KERNEL_OK")
</pallas_src>

<mosaic_0001>
module attributes {stable_mosaic.version = 11 : i64} {
  func.func @_yolor_addnms_kernel(%arg0: i32, %arg1: i32, %arg2: memref<1x32x128xf32, #tpu.memory_space<vmem>>, %arg3: memref<32x128xf32, #tpu.memory_space<vmem>>, %arg4: memref<1x128xf32, #tpu.memory_space<vmem>>, %arg5: memref<1x128x128xf32, #tpu.memory_space<vmem>>) attributes {dimension_semantics = [#tpu.dimension_semantics<parallel>, #tpu.dimension_semantics<parallel>], iteration_bounds = array<i64: 2, 2>, scalar_prefetch = 0 : i64, scratch_operands = 0 : i64, tpu.core_type = #tpu.core_type<tc>, window_params = [{transform_indices = @transform_0, window_bounds = array<i64: 1, 32, 128>}, {pipeline_mode = #tpu.pipeline_mode<synchronous>, transform_indices = @transform_1, window_bounds = array<i64: 32, 128>}, {pipeline_mode = #tpu.pipeline_mode<synchronous>, transform_indices = @transform_2, window_bounds = array<i64: 1, 128>}, {transform_indices = @transform_3, window_bounds = array<i64: 1, 128, 128>}]} {
    %c0 = arith.constant 0 : index
    %c0_0 = arith.constant 0 : index
    %c0_1 = arith.constant 0 : index
    %0 = vector.load %arg2[%c0, %c0_0, %c0_1] : memref<1x32x128xf32, #tpu.memory_space<vmem>>, vector<1x32x128xf32>
    %1 = vector.shape_cast %0 : vector<1x32x128xf32> to vector<32x128xf32>
    %c0_2 = arith.constant 0 : index
    %c0_3 = arith.constant 0 : index
    %2 = vector.load %arg3[%c0_2, %c0_3] : memref<32x128xf32, #tpu.memory_space<vmem>>, vector<32x128xf32>
    %cst = arith.constant dense<0.000000e+00> : vector<128x128xf32>
    %3 = tpu.matmul %1, %2, %cst {dimension_numbers = #tpu.dot_dimension_numbers<[0], [0], [1], [1], [0, 1, 1, 1], [], []>} : vector<32x128xf32>, vector<32x128xf32>, vector<128x128xf32> -> vector<128x128xf32>
    %c0_4 = arith.constant 0 : index
    %c0_5 = arith.constant 0 : index
    %4 = vector.load %arg4[%c0_4, %c0_5] : memref<1x128xf32, #tpu.memory_space<vmem>>, vector<1x128xf32>
    %5 = vector.broadcast %4 : vector<1x128xf32> to vector<128x128xf32>
    %6 = arith.addf %3, %5 : vector<128x128xf32>
    %7 = vector.extract_strided_slice %6 {offsets = [0, 4], sizes = [128, 1], strides = [1, 1]} : vector<128x128xf32> to vector<128x1xf32>
    %8 = tpu.iota {dimensions = array<i32: 1>} : vector<128x128xi32>
    %c5_i32 = arith.constant 5 : i32
    %9 = vector.broadcast %c5_i32 : i32 to vector<128x128xi32>
    %10 = arith.cmpi sge, %8, %9 : vector<128x128xi32>
    %11 = vector.broadcast %7 : vector<128x1xf32> to vector<128x128xf32>
    %12 = arith.mulf %6, %11 : vector<128x128xf32>
    %13 = arith.select %10, %12, %6 : vector<128x128xi1>, vector<128x128xf32>
    %c0_6 = arith.constant 0 : index
    %c0_7 = arith.constant 0 : index
    %c0_8 = arith.constant 0 : index
    %14 = vector.load %arg5[%c0_6, %c0_7, %c0_8] : memref<1x128x128xf32, #tpu.memory_space<vmem>>, vector<1x128x128xf32>
    %15 = vector.shape_cast %14 : vector<1x128x128xf32> to vector<128x128xf32>
    %16 = vector.shape_cast %13 : vector<128x128xf32> to vector<1x128x128xf32>
    tpu.vector_store %arg5[%c0_6, %c0_7, %c0_8], %16 {strides = array<i32>} : memref<1x128x128xf32, #tpu.memory_space<vmem>>, vector<1x128x128xf32>,
    return
  }
  func.func @transform_0(%arg0: i32, %arg1: i32) -> (i32, i32, i32) {
    %c0_i32 = arith.constant 0 : i32
    %c0_i32_0 = arith.constant 0 : i32
    return %arg0, %c0_i32, %arg1 : i32, i32, i32
  }
  func.func @transform_1(%arg0: i32, %arg1: i32) -> (i32, i32) {
    %c0_i32 = arith.constant 0 : i32
    %c0_i32_0 = arith.constant 0 : i32
    %c0_i32_1 = arith.constant 0 : i32
    return %c0_i32, %c0_i32_0 : i32, i32
  }
  func.func @transform_2(%arg0: i32, %arg1: i32) -> (i32, i32) {
    %c0_i32 = arith.constant 0 : i32
    %c0_i32_0 = arith.constant 0 : i32
    %c0_i32_1 = arith.constant 0 : i32
    return %c0_i32, %c0_i32_0 : i32, i32
  }
  func.func @transform_3(%arg0: i32, %arg1: i32) -> (i32, i32, i32) {
    %c0_i32 = arith.constant 0 : i32
    %c0_i32_0 = arith.constant 0 : i32
    return %arg0, %arg1, %c0_i32 : i32, i32, i32
  }
}

</mosaic_0001>

<bundles_post_ra>
// kernel: tpu_custom_call.1
= control target key start
LH: loop header
LB: loop body
LE: loop exit
PB: predicated region body
PF: predicated region fallthrough
CT: control target
= control target key end

     0   :  { %s1458_s0 = inlined_call_operand.hbm [shape: f32[2,32,256], index: 0, kind: input, shape index: {}]   ;;  %s1459_s1 = inlined_call_operand.hbm [shape: f32[32,128], index: 1, kind: input, shape index: {}]   ;;  %s1460_s2 = inlined_call_operand.vmem [shape: f32[1,128], index: 2, kind: input, shape index: {}]   ;;  %s1461_s3 = inlined_call_operand.hbm [shape: f32[2,256,128], index: 3, kind: output, shape index: {}]  }
   0x1   :  { %1471 = sst [smem:[#allocation12_spill]] %s1459_s1 }
   0x2   :  { %8 = vsyncpa [#allocation3], 0 }
   0x3   :  { %10 = vsyncpa [#allocation3 + $0x1], 0 }
   0x4   :  { %11 = vsyncpa [#allocation6], 0 }
   0x5   :  { %12 = vsyncpa [#allocation4], 0 }
   0x6   :  { %14 = vsyncpa [#allocation4 + $0x1], 0  ;;  %s1097_s12 = smov 0   ;;  %s1099_s13 = smov 0  }
   0x7   :  { %s1101_s14 = smov 0   ;;  %s1103_s15 = smov 0  }
   0x8   :  { %s1105_s16 = smov 0   ;;  %s1107_s17 = smov 0  }
   0x9   :  { %s1109_s18 = smov 0   ;;  %s1111_s19 = smov 0  }
   0xa LB: > { %s709_s20 = sadd.s32 4294967295, %s1066_s19   ;;  %s710_s21 = sadd.s32 4294967294, %s1066_s19   ;;  %s1066_s19 = sphi %s1111_s19, %s20_s19   ;;  %s1062_s18 = sphi %s1109_s18, %s1498_s18   ;;  %s1058_s17 = sphi %s1107_s17, %s1497_s17   ;;  %s1054_s16 = sphi %s1105_s16, %s1496_s16   ;;  %s1050_s15 = sphi %s1103_s15, %s1495_s15   ;;  %s1046_s14 = sphi %s1101_s14, %s1494_s14   ;;  %s1042_s13 = sphi %s1099_s13, %s1493_s13   ;;  %s1038_s12 = sphi %s1097_s12, %s1492_s12  }
   0xb   : > { %p48_p0 = scmp.ne.s32.totalorder %s1046_s14, %s1042_s13  ;;  %p49_p1 = scmp.eq.s32.totalorder %s1066_s19, 0 }
   0xc   : > { %p54_p2 = scmp.ne.s32.totalorder %s1042_s13, %s1038_s12  ;;  %p1145_p3 = scmp.eq.s32.totalorder %s709_s20, 0 }
   0xd   : > { %p122_p4 = scmp.eq.s32.totalorder %s709_s20, 3  ;;  %p1149_p5 = por %p49_p1, %p48_p0 }
   0xe   : > { %s1472_s23 = scalar_select %p1145_p3, 1, 0 }
   0xf   : > { %p128_p6 = scmp.eq.s32.totalorder %s710_s21, 3  ;;  %p1155_p7 = por %p1145_p3, %p54_p2 }
  0x10   : > { %p1159_p8 = por %p122_p4, %p48_p0  ;;  %p711_p10 = scmp.ge.s32.totalorder %s1066_s19, 1 }
  0x11   : > { %s1474_s25 = scalar_select %p1155_p7, 1, 0 }
  0x12   : > { %s1475_s26 = scalar_select %p1159_p8, 1, 0 }
  0x13   : > { %p1163_p9 = por %p128_p6, %p54_p2  ;;  %p135_p11 = scmp.lt.s32.totalorder %s1066_s19, 5 }
  0x14   : > { %s1068_s29 = smov [#allocation5]   ;;  %p829_p0 = scmp.lt.s32.totalorder %s1066_s19, 4 }
  0x15   : > { %s1476_s27 = scalar_select %p1163_p9, 1, 0 }
  0x16   : > { %p1169_p12 = pnand %p711_p10, %p135_p11  ;;  %s147_s30 = sshll.u32 %s1068_s29, 4  ;;  %s148_s30 = int_to_ptr.vmem [resolvable:$true] %s147_s30 }
  0x17   : > { %p1184_p2 = pnand %p829_p0, %p1149_p5  ;;  %s1480_s1 = sld [smem:[#allocation12_spill]] }
  0x18   : > { %s1477_s28 = scalar_select %p1169_p12, 1, 0 }
  0x19   : > { %p816_p13 = pneg %p1169_p12 }
  0x1a   : > { %s1479_s5 = scalar_select %p1184_p2, 1, 0 }
  0x1b   : > { %p1178_p1 = pnand %p816_p13, %p1145_p3 }
  0x1d   : > { %s906_s8 = scalar_lea.hbm %s1480_s1, 512  ;;  %p908_p6 = pneg %p1178_p1 }
  0x1e   : > { %p907_p4 = scmp.ne.s32.totalorder %s1480_s1, %s906_s8  ;;  %p913_p13 = scmp.lt.u32.totalorder %s906_s8, %s1480_s1 }
  0x20   : > { %p909_p10 = pnand %p908_p6, %p907_p4 }
  0x22   : > { %p910_p11 = pneg %p909_p10 }
  0x24   : > { %p915_p5 = pnand %p913_p13, %p910_p11 }
  0x26   : > { %918 = shalt.err (!%p915_p5)
}
  0x27   : > { %s919_s21 = scalar_lea.vmem %s148_s30, 512  ;;  %p927_p3 = scmp.lt.s32.totalorder %s148_s30, %s148_s30 }
  0x28   : > { %p920_p0 = scmp.ne.s32.totalorder %s148_s30, %s919_s21  ;;  %p928_p7 = scmp.lt.s32.totalorder %s919_s21, %s919_s21 }
  0x2a   : > { %p922_p9 = pnand %p920_p0, %p908_p6  ;;  %p929_p12 = por %p928_p7, %p927_p3 }
  0x2c   : > { %p923_p8 = pneg %p922_p9 }
  0x2e   : > { %p930_p2 = pnand %p929_p12, %p923_p8 }
  0x30   : > { %933 = shalt.err (!%p930_p2)
}
  0x31   : > { %s1468_s24 = smov 128   ;;  %s1469_s29 = smov 8  }
  0x32   : > { %819 = dma.hbm_to_vmem [thread:$0]  (!%p1178_p1), %s1480_s1, 512, %s148_s30, [#allocation6], %s1468_s24, %s1468_s24, %s1469_s29  }
  0x33   : > { %s29_s8 = sadd.s32 1, %s1058_s17  ;;  %s32_s9 = sadd.s32 1, %s1062_s18 }
  0x34   : > { %p30_p3 = scmp.ge.s32.totalorder %s29_s8, 2  ;;  %s164_s10 = sand.u32 1, %s1046_s14  }
  0x35   : > { %s715_s11 = sshll.u32 %s1062_s18, 3  ;;  %s714_s4 = sshll.u32 %s164_s10, 5 }
  0x36   : > { %s1500_s8 = smov (%p30_p3, %s29_s8), 0  ;;  %s1502_s9 = smov (!%p30_p3, %s32_s9), %s1062_s18 }
  0x37   : > { %1481 = sst [smem:[#allocation11_spill]] %s1500_s8  ;;  %s37_s20 = ssub.s32 %s1058_s17, %s1500_s8 }
  0x38   : > { %p34_p7 = scmp.ge.s32.totalorder %s1502_s9, 2  ;;  %s173_s21 = sadd.s32 %s1058_s17, %s715_s11 }
  0x39   : > { %s716_s30 = sshll.u32 %s173_s21, 7  ;;  %s168_s6 = scalar_lea.vmem [#allocation2], %s714_s4 }
  0x3a   : > { %s1504_s9 = smov (%p34_p7, %s1502_s9), 0  ;;  %s176_s7 = sshll.u32 %s168_s6, 4  ;;  %s1228_s7 = int_to_ptr.vmem [resolvable:$true] %s176_s7 }
  0x3b   : > { %s36_s22 = ssub.s32 %s1062_s18, %s1504_s9  ;;  %s1224_s1 = scalar_lea.hbm %s1458_s0, %s716_s30 }
  0x3c   : > { %s1226_s8 = sor.u32 %s37_s20, %s36_s22  ;;  %s1231_s11 = scalar_lea.sflag [#allocation3], %s164_s10 }
  0x3d   : > { %p39_p8 = scmp.eq.s32.totalorder %s1226_s8, 0  ;;  %s934_s4 = scalar_lea.hbm %s1224_s1, 512 }
  0x3e   : > { %p935_p9 = scmp.ne.s32.totalorder %s1224_s1, %s934_s4  ;;  %p1482_p12 = scmp.ne.s32.totalorder %s1479_s5, 0 }
  0x3f   : > { %s939_s21 = scalar_lea.hbm %s1458_s0, 2048  ;;  %p940_p6 = scmp.lt.u32.totalorder %s1224_s1, %s1458_s0 }
  0x40   : > { %p936_p1 = pneg %p1482_p12  ;;  %p941_p10 = scmp.lt.u32.totalorder %s939_s21, %s934_s4 }
  0x41   : > { %p943_p13 = scmp.lt.u32.totalorder %s934_s4, %s1224_s1 }
  0x42   : > { %p937_p2 = pnand %p936_p1, %p935_p9  ;;  %p942_p11 = por %p941_p10, %p940_p6 }
  0x44   : > { %p938_p4 = pneg %p937_p2  ;;  %p944_p5 = por %p943_p13, %p942_p11 }
  0x46   : > { %p945_p0 = pnand %p944_p5, %p938_p4 }
  0x48   : > { %948 = shalt.err (!%p945_p0)
}
  0x49   : > { %s949_s10 = scalar_lea.vmem %s1228_s7, 512  ;;  %s1071_s30 = smov [#allocation2]  }
  0x4a   : > { %p950_p3 = scmp.ne.s32.totalorder %s1228_s7, %s949_s10  ;;  %s954_s6 = sshll.u32 %s1071_s30, 4  ;;  %s955_s6 = int_to_ptr.vmem [resolvable:$false] %s954_s6 }
  0x4b   : > { %s956_s24 = scalar_lea.vmem %s955_s6, 1024  ;;  %p957_p2 = scmp.lt.s32.totalorder %s1228_s7, %s955_s6 }
  0x4c   : > { %p952_p7 = pnand %p950_p3, %p936_p1  ;;  %p958_p6 = scmp.lt.s32.totalorder %s956_s24, %s949_s10 }
  0x4e   : > { %p953_p9 = pneg %p952_p7  ;;  %p959_p10 = por %p958_p6, %p957_p2 }
  0x50   : > { %p960_p11 = pnand %p959_p10, %p953_p9 }
  0x52   : > { %963 = shalt.err (!%p960_p11)
}
  0x53   : > { %s1072_s4 = smov 256   ;;  %s1483_s29 = smov 8  }
  0x54   : > { %s1484_s21 = smov 128   ;;  %s1485_s22 = sadd.s32 1, %s1046_s14 }
  0x55   : > { %823 = dma.hbm_to_vmem [thread:$0]  (!%p1482_p12), %s1224_s1, 512, %s1228_s7, %s1231_s11, %s1072_s4, %s1484_s21, %s1483_s29  }
  0x56   : > { %s1266_s20 = scalar_select %p39_p8, %s1046_s14, %s1485_s22  }
  0x57   : > { %p1486_p1 = scmp.ne.s32.totalorder %s1477_s28, 0 }
  0x58   : > { %s1271_s10 = sand.u32 (!%p1486_p1), 1, %s1042_s13   ;;  %p1487_p4 = scmp.ne.s32.totalorder (!%p1486_p1), %s1474_s25, 0 }
  0x59   : > { %188 = sbr.rel (%p1486_p1) target bundleno = 655 (0x28f), region = 32  ;;  %s718_s5 = sshll.u32 (!%p1486_p1), %s1271_s10, 5 }
  0x5a   : > { %s191_s30 = scalar_lea.sflag (!%p1486_p1), [#allocation3], %s1271_s10  ;;  %s194_s6 = scalar_lea.vmem (!%p1486_p1), [#allocation2], %s718_s5 }
  0x60   : > { %1025 = dma.done.wait (%p1487_p4), %s191_s30, 512  }
  0x61   : > { %1027 = vsyncadd (%p1487_p4), %s191_s30, 4294966784  ;;  %p1488_p8 = scmp.ne.s32.totalorder %s1472_s23, 0 }
  0x63   : > { %1029 = dma.done.wait (%p1488_p8), [#allocation6], 512  }
  0x64   : > { %1031 = vsyncadd (%p1488_p8), [#allocation6], 4294966784  ;;  %v222_v0 = vld [vmem:[%s194_s6] sm:$0xff]  ;;  %v227_v2 = vld [vmem:[#allocation5 + $0x8] sm:$0xff]  ;;  %vm269_vm0 = vcmask 261120   ;;  %v1073_v26 = vmov 4   ;;  %v463_v60 = vlaneseq }
  0x65   : > { %237 = vxpose.xlu0.b32.start [1/4] (short) %v222_v0, 128  ;;  %v226_v1 = vld [vmem:[#allocation5] sm:$0xff]  ;;  %v223_v3 = vld [vmem:[%s194_s6 + $0x8] sm:$0xff]  ;;  %v228_v5 = vld [vmem:[#allocation5 + $0x10] sm:$0xff]  ;;  %904 = vset.pattern.permute.xlu1 %v1073_v26  ;;  %s720_s25 = sshll.u32 %s1271_s10, 7  ;;  %s739_s8 = sshll.u32 %s1050_s15, 4 }
  0x66   : > { %v796_v4 = vpack.c.bf16 %v227_v2, %v226_v1  ;;  %v229_v6 = vld [vmem:[#allocation5 + $0x18] sm:$0xff]  ;;  %v224_v8 = vld [vmem:[%s194_s6 + $0x10] sm:$0xff]  ;;  %v721_v27 = vld [vmem:[%s1460_s2] ss:$0 sm:$0xff]  ;;  %v1326_v61 = vand.u32 127, %v463_v60  ;;  %s1332_s28 = scalar_lea.vmem [#allocation7], %s720_s25 }
  0x67   : > { %v800_v7 = vpack.c.bf16 %v229_v6, %v228_v5  ;;  %v225_v9 = vld [vmem:[%s194_s6 + $0x18] sm:$0xff]  ;;  %s740_s7 = sshll.u32 %s1054_s16, 5  ;;  %s610_s4 = sshll.u32 %s1332_s28, 4  ;;  %s1400_s4 = int_to_ptr.vmem [resolvable:$true] %s610_s4 }
  0x68   : > { %797 = vmatprep.subr.bf16.mxu0 %v796_v4  ;;  %804 = vmatprep.subr.bf16.mxu1 %v796_v4  ;;  %vm465_vm1 = vcmp.ge.s32.totalorder %v1326_v61, 5  ;;  %s607_s11 = sadd.s32 %s740_s7, %s739_s8  ;;  %s595_s21 = scalar_lea.sflag [#allocation4], %s1271_s10 }
  0x69   : > { %238 = vxpose.xlu0.b32.cont [2/4] (short) %v223_v3, 128  ;;  %799 = vmatpush3.bf16.msra.mxu0 %v796_v4  ;;  %s741_s24 = sshll.u32 %s607_s11, 7  ;;  %s964_s22 = scalar_lea.vmem %s1400_s4, 2048 }
  0x6a   : > { %801 = vmatprep.subr.bf16.mxu0 %v800_v7  ;;  %806 = vmatpush3.bf16.msra.mxu1 %v796_v4  ;;  %s1398_s29 = scalar_lea.hbm %s1461_s3, %s741_s24  ;;  %p965_p12 = scmp.ne.s32.totalorder %s1400_s4, %s964_s22 }
  0x6b   : > { %805 = vmatprep.subr.bf16.mxu1 %v800_v7  ;;  %p1489_p13 = scmp.ne.s32.totalorder %s1475_s26, 0  ;;  %s1074_s5 = smov [#allocation7]  }
  0x6c   : > { %s968_s30 = sshll.u32 %s1074_s5, 4  ;;  %s969_s30 = int_to_ptr.vmem [resolvable:$false] %s968_s30 }
  0x6d   : > { %239 = vxpose.xlu0.b32.cont [3/4] (short) %v224_v8, 128  ;;  %803 = vmatpush3.bf16.msra.mxu0 %v800_v7  ;;  %p966_p5 = pnand %p965_p12, %p1489_p13  ;;  %s970_s6 = scalar_lea.vmem %s969_s30, 4096 }
  0x6e   : > { %807 = vmatpush3.bf16.msra.mxu1 %v800_v7  ;;  %p971_p3 = scmp.lt.s32.totalorder %s1400_s4, %s969_s30  ;;  %p972_p7 = scmp.lt.s32.totalorder %s970_s6, %s964_s22 }
  0x6f   : > { %p967_p0 = pneg %p966_p5 }
  0x70   : > { %p973_p9 = por %p972_p7, %p971_p3 }
  0x71   : > { %240 = vxpose.xlu0.b32.end [4/4] (short) %v225_v9, 128 }
  0x72   : > { %p974_p2 = pnand %p973_p9, %p967_p0 }
  0x9a   : > { %905 = vset.pattern.permute.xlu0 %v1073_v26 }
  0xe5   : > { %v253_v10 = vpop.trf.xlu0 }
  0xe6   : > { %772 = vmatprep.mubr.msk.f32.mxu0 %vm269_vm0, %v253_v10 }
  0xe9   : > { %v254_v11 = vpop.trf.xlu0 }
  0xea   : > { %773 = vmatmul.mubr.msk.f32.vlgmr.msra.gmra.mrb[0].mxu0 %vm269_vm0, %v254_v11 }
  0xed   : > { %v255_v12 = vpop.trf.xlu0 }
  0xee   : > { %775 = vmatprep.mubr.msk.f32.mxu0 %vm269_vm0, %v255_v12 }
  0xf1   : > { %v256_v13 = vpop.trf.xlu0 }
  0xf2   : > { %776 = vmatmul.mubr.msk.f32.gmra.mrb[2].mxu0 %vm269_vm0, %v256_v13 }
  0xf5   : > { %v257_v14 = vpop.trf.xlu0 }
  0xf6   : > { %778 = vmatprep.mubr.msk.f32.mxu0 %vm269_vm0, %v257_v14 }
  0xf9   : > { %v258_v15 = vpop.trf.xlu0 }
  0xfa   : > { %779 = vmatmul.mubr.msk.f32.gmra.mrb[4].mxu0 %vm269_vm0, %v258_v15 }
  0xfd   : > { %v259_v16 = vpop.trf.xlu0 }
  0xfe   : > { %781 = vmatprep.mubr.msk.f32.mxu0 %vm269_vm0, %v259_v16 }
 0x101   : > { %v260_v17 = vpop.trf.xlu0 }
 0x102   : > { %782 = vmatmul.mubr.msk.f32.gmra.mrb[6].mxu0 %vm269_vm0, %v260_v17 }
 0x105   : > { %v261_v18 = vpop.trf.xlu0 }
 0x106   : > { %784 = vmatprep.mubr.msk.f32.mxu1 %vm269_vm0, %v261_v18 }
 0x109   : > { %v262_v19 = vpop.trf.xlu0 }
 0x10a   : > { %785 = vmatmul.mubr.msk.f32.vlgmr.msra.gmra.mrb[0].mxu1 %vm269_vm0, %v262_v19 }
 0x10d   : > { %v263_v20 = vpop.trf.xlu0 }
 0x10e   : > { %787 = vmatprep.mubr.msk.f32.mxu1 %vm269_vm0, %v263_v20 }
 0x111   : > { %v264_v21 = vpop.trf.xlu0 }
 0x112   : > { %788 = vmatmul.mubr.msk.f32.gmra.mrb[2].mxu1 %vm269_vm0, %v264_v21 }
 0x115   : > { %v265_v22 = vpop.trf.xlu0 }
 0x116   : > { %790 = vmatprep.mubr.msk.f32.mxu1 %vm269_vm0, %v265_v22 }
 0x119   : > { %v266_v23 = vpop.trf.xlu0 }
 0x11a   : > { %791 = vmatmul.mubr.msk.f32.gmra.mrb[4].mxu1 %vm269_vm0, %v266_v23 }
 0x11d   : > { %v267_v24 = vpop.trf.xlu0 }
 0x11e   : > { %793 = vmatprep.mubr.msk.f32.mxu1 %vm269_vm0, %v267_v24 }
 0x121   : > { %v268_v25 = vpop.trf.xlu0 }
 0x122   : > { %794 = vmatmul.mubr.msk.f32.gmra.mrb[6].mxu1 %vm269_vm0, %v268_v25 }
 0x1bd   : > { %v774_v28 = vpop.f32.mrb[0].mxu0 }
 0x1be   : > { %v390_v29 = vadd.f32 %v774_v28, %v721_v27  ;;  %v384_v30 = vpop.f32.mrb[1].mxu0 }
 0x1bf   : > { %v385_v31 = vadd.f32 %v721_v27, %v384_v30 }
 0x1c0   : > { %473 = vperm.xlu1 %904, %v390_v29  }
 0x1c4   : > { %468 = vperm.xlu1 %904, %v385_v31  }
 0x1c5   : > { %v777_v32 = vpop.f32.mrb[2].mxu0 }
 0x1c6   : > { %v400_v33 = vadd.f32 %v777_v32, %v721_v27  ;;  %v394_v34 = vpop.f32.mrb[3].mxu0 }
 0x1c7   : > { %v395_v35 = vadd.f32 %v721_v27, %v394_v34 }
 0x1c8   : > { %483 = vperm.xlu1 %904, %v400_v33  }
 0x1cc   : > { %478 = vperm.xlu1 %904, %v395_v35  }
 0x1cd   : > { %v780_v36 = vpop.f32.mrb[4].mxu0 }
 0x1ce   : > { %v410_v37 = vadd.f32 %v780_v36, %v721_v27  ;;  %v404_v38 = vpop.f32.mrb[5].mxu0 }
 0x1cf   : > { %v405_v39 = vadd.f32 %v721_v27, %v404_v38 }
 0x1d0   : > { %493 = vperm.xlu1 %904, %v410_v37  }
 0x1d1   : > { %488 = vperm.xlu0 %905, %v405_v39  }
 0x1d5   : > { %v783_v40 = vpop.f32.mrb[6].mxu0 }
 0x1d6   : > { %v420_v41 = vadd.f32 %v783_v40, %v721_v27  ;;  %v414_v42 = vpop.f32.mrb[7].mxu0 }
 0x1d7   : > { %v415_v43 = vadd.f32 %v721_v27, %v414_v42 }
 0x1d8   : > { %503 = vperm.xlu1 %904, %v420_v41  }
 0x1dc   : > { %498 = vperm.xlu1 %904, %v415_v43  }
 0x1dd   : > { %v786_v44 = vpop.f32.mrb[0].mxu1 }
 0x1de   : > { %v1302_v45 = vadd.f32 %v786_v44, %v721_v27  ;;  %v424_v46 = vpop.f32.mrb[1].mxu1 }
 0x1df   : > { %v1305_v47 = vadd.f32 %v721_v27, %v424_v46 }
 0x1e0   : > { %513 = vperm.xlu1 %904, %v1302_v45  }
 0x1e4   : > { %508 = vperm.xlu1 %904, %v1305_v47  }
 0x1e5   : > { %v789_v48 = vpop.f32.mrb[2].mxu1 }
 0x1e6   : > { %v1308_v49 = vadd.f32 %v789_v48, %v721_v27  ;;  %v434_v50 = vpop.f32.mrb[3].mxu1 }
 0x1e7   : > { %v1311_v51 = vadd.f32 %v721_v27, %v434_v50 }
 0x1e8   : > { %523 = vperm.xlu1 %904, %v1308_v49  }
 0x1ec   : > { %518 = vperm.xlu1 %904, %v1311_v51  }
 0x1ed   : > { %v792_v52 = vpop.f32.mrb[4].mxu1 }
 0x1ee   : > { %v1314_v53 = vadd.f32 %v792_v52, %v721_v27  ;;  %v444_v54 = vpop.f32.mrb[5].mxu1 }
 0x1ef   : > { %v1317_v55 = vadd.f32 %v721_v27, %v444_v54 }
 0x1f0   : > { %533 = vperm.xlu1 %904, %v1314_v53  }
 0x1f4   : > { %528 = vperm.xlu1 %904, %v1317_v55  }
 0x1f5   : > { %v795_v56 = vpop.f32.mrb[6].mxu1 }
 0x1f6   : > { %v454_v57 = vpop.f32.mrb[7].mxu1  ;;  %v1323_v59 = vadd.f32 %v795_v56, %v721_v27 }
 0x1f7   : > { %v1320_v58 = vadd.f32 %v721_v27, %v454_v57 }
 0x1f9   : > { %538 = vperm.xlu1 %904, %v1320_v58  }
 0x1fd   : > { %543 = vperm.xlu1 %904, %v1323_v59  }
 0x23f   : > { %v474_v62 = vpop.permute.xlu1 %473 }
 0x240   : > { %v547_v63 = vmul.f32 %v474_v62, %v390_v29 }
 0x242   : > { %v563_v0 = vsel %vm465_vm1, %v547_v63, %v390_v29 }
 0x243   : > { %579 = vst [vmem:[%s1332_s28 + $0x8] sm:$0xff] %v563_v0  ;;  %v469_v1 = vpop.permute.xlu1 %468 }
 0x244   : > { %v546_v2 = vmul.f32 %v469_v1, %v385_v31 }
 0x246   : > { %v562_v3 = vsel %vm465_vm1, %v546_v2, %v385_v31 }
 0x247   : > { %578 = vst [vmem:[%s1332_s28] sm:$0xff] %v562_v3  ;;  %v484_v4 = vpop.permute.xlu1 %483 }
 0x248   : > { %v549_v5 = vmul.f32 %v484_v4, %v400_v33 }
 0x24a   : > { %v565_v6 = vsel %vm465_vm1, %v549_v5, %v400_v33 }
 0x24b   : > { %581 = vst [vmem:[%s1332_s28 + $0x18] sm:$0xff] %v565_v6  ;;  %v479_v7 = vpop.permute.xlu1 %478 }
 0x24c   : > { %v548_v8 = vmul.f32 %v479_v7, %v395_v35 }
 0x24e   : > { %v564_v9 = vsel %vm465_vm1, %v548_v8, %v395_v35 }
 0x24f   : > { %580 = vst [vmem:[%s1332_s28 + $0x10] sm:$0xff] %v564_v9  ;;  %v494_v10 = vpop.permute.xlu1 %493 }
 0x250   : > { %v551_v11 = vmul.f32 %v494_v10, %v410_v37  ;;  %v489_v12 = vpop.permute.xlu0 %488 }
 0x251   : > { %v550_v13 = vmul.f32 %v489_v12, %v405_v39 }
 0x252   : > { %v567_v14 = vsel %vm465_vm1, %v551_v11, %v410_v37 }
 0x253   : > { %583 = vst [vmem:[%s1332_s28 + $0x28] sm:$0xff] %v567_v14  ;;  %v566_v15 = vsel %vm465_vm1, %v550_v13, %v405_v39 }
 0x254   : > { %582 = vst [vmem:[%s1332_s28 + $0x20] sm:$0xff] %v566_v15 }
 0x257   : > { %v504_v16 = vpop.permute.xlu1 %503 }
 0x258   : > { %v553_v17 = vmul.f32 %v504_v16, %v420_v41 }
 0x25a   : > { %v569_v18 = vsel %vm465_vm1, %v553_v17, %v420_v41 }
 0x25b   : > { %585 = vst [vmem:[%s1332_s28 + $0x38] sm:$0xff] %v569_v18  ;;  %v499_v19 = vpop.permute.xlu1 %498 }
 0x25c   : > { %v552_v20 = vmul.f32 %v499_v19, %v415_v43 }
 0x25e   : > { %v568_v21 = vsel %vm465_vm1, %v552_v20, %v415_v43 }
 0x25f   : > { %584 = vst [vmem:[%s1332_s28 + $0x30] sm:$0xff] %v568_v21  ;;  %v514_v22 = vpop.permute.xlu1 %513 }
 0x260   : > { %v555_v23 = vmul.f32 %v514_v22, %v1302_v45 }
 0x262   : > { %v571_v24 = vsel %vm465_vm1, %v555_v23, %v1302_v45 }
 0x263   : > { %587 = vst [vmem:[%s1332_s28 + $0x48] sm:$0xff] %v571_v24  ;;  %v509_v25 = vpop.permute.xlu1 %508 }
 0x264   : > { %v554_v26 = vmul.f32 %v509_v25, %v1305_v47 }
 0x266   : > { %v570_v27 = vsel %vm465_vm1, %v554_v26, %v1305_v47 }
 0x267   : > { %586 = vst [vmem:[%s1332_s28 + $0x40] sm:$0xff] %v570_v27  ;;  %v524_v28 = vpop.permute.xlu1 %523 }
 0x268   : > { %v557_v29 = vmul.f32 %v524_v28, %v1308_v49 }
 0x26a   : > { %v573_v30 = vsel %vm465_vm1, %v557_v29, %v1308_v49 }
 0x26b   : > { %589 = vst [vmem:[%s1332_s28 + $0x58] sm:$0xff] %v573_v30  ;;  %v519_v31 = vpop.permute.xlu1 %518 }
 0x26c   : > { %v556_v32 = vmul.f32 %v519_v31, %v1311_v51 }
 0x26e   : > { %v572_v33 = vsel %vm465_vm1, %v556_v32, %v1311_v51 }
 0x26f   : > { %588 = vst [vmem:[%s1332_s28 + $0x50] sm:$0xff] %v572_v33  ;;  %v534_v34 = vpop.permute.xlu1 %533 }
 0x270   : > { %v559_v35 = vmul.f32 %v534_v34, %v1314_v53 }
 0x272   : > { %v575_v36 = vsel %vm465_vm1, %v559_v35, %v1314_v53 }
 0x273   : > { %591 = vst [vmem:[%s1332_s28 + $0x68] sm:$0xff] %v575_v36  ;;  %v529_v37 = vpop.permute.xlu1 %528 }
 0x274   : > { %v558_v38 = vmul.f32 %v529_v37, %v1317_v55 }
 0x276   : > { %v574_v39 = vsel %vm465_vm1, %v558_v38, %v1317_v55 }
 0x277   : > { %590 = vst [vmem:[%s1332_s28 + $0x60] sm:$0xff] %v574_v39 }
 0x278   : > { %v539_v40 = vpop.permute.xlu1 %538 }
 0x279   : > { %v560_v41 = vmul.f32 %v539_v40, %v1320_v58 }
 0x27b   : > { %v576_v42 = vsel %vm465_vm1, %v560_v41, %v1320_v58 }
 0x27c   : > { %592 = vst [vmem:[%s1332_s28 + $0x70] sm:$0xff] %v576_v42  ;;  %v544_v43 = vpop.permute.xlu1 %543 }
 0x27d   : > { %v561_v44 = vmul.f32 %v544_v43, %v1323_v59 }
 0x27f   : > { %v577_v45 = vsel %vm465_vm1, %v561_v44, %v1323_v59 }
 0x280   : > { %593 = vst [vmem:[%s1332_s28 + $0x78] sm:$0xff] %v577_v45 }
 0x281   : > { %977 = shalt.err (!%p974_p2)
}
 0x282   : > { %s978_s1 = scalar_lea.hbm %s1398_s29, 2048  ;;  %s982_s28 = scalar_lea.hbm %s1461_s3, 8192 }
 0x283   : > { %p979_p6 = scmp.ne.s32.totalorder %s1398_s29, %s978_s1  ;;  %p983_p1 = scmp.lt.u32.totalorder %s1398_s29, %s1461_s3 }
 0x284   : > { %p984_p4 = scmp.lt.u32.totalorder %s982_s28, %s978_s1  ;;  %p986_p12 = scmp.lt.u32.totalorder %s978_s1, %s1398_s29 }
 0x285   : > { %p980_p10 = pnand %p979_p6, %p1489_p13 }
 0x286   : > { %p985_p8 = por %p984_p4, %p983_p1 }
 0x287   : > { %p981_p11 = pneg %p980_p10 }
 0x288   : > { %p987_p5 = por %p986_p12, %p985_p8 }
 0x28a   : > { %p988_p0 = pnand %p987_p5, %p981_p11 }
 0x28c   : > { %991 = shalt.err (!%p988_p0)
}
 0x28d   : > { %s1075_s11 = smov 128   ;;  %s1076_s24 = smov 8  }
 0x28e   : > { %814 = dma.vmem_to_hbm [thread:$0]  (%p1489_p13), %s1400_s4, 2048, %s1398_s29, %s595_s21, %s1075_s11, %s1075_s11, %s1076_s24  }
 0x28f PF: > { %p831_p3 = scmp.ge.s32.totalorder %s1066_s19, 2  ;;  %s625_s15 = sand.u32 1, %s1038_s12  }
 0x290   : > { %p1490_p7 = scmp.ne.s32.totalorder %s1476_s27, 0  ;;  %s626_s16 = scalar_lea.sflag [#allocation4], %s625_s15 }
 0x292   : > { %p825_p9 = pnand %p831_p3, %p1490_p7 }
 0x294   : > { %1033 = dma.done.wait (!%p825_p9), %s626_s16, 2048  }
 0x295   : > { %1035 = vsyncadd (!%p825_p9), %s626_s16, 4294965248  ;;  %s20_s19 = sadd.s32 1, %s1066_s19   ;;  %s1491_s26 = sld [smem:[#allocation11_spill]] }
 0x296   : > { %p17_p2 = scmp.ge.s32.totalorder %s20_s19, 6   ;;  %s1492_s12 = smov %s1042_s13 }
 0x297   : > { %s1493_s13 = smov %s1046_s14  ;;  %s1494_s14 = smov %s1266_s20 }
 0x298   : > { %s1495_s15 = smov %s1058_s17  ;;  %s1496_s16 = smov %s1062_s18 }
 0x299   : > { %s1498_s18 = smov %s1504_s9  ;;  %19 = sbr.rel (!%p17_p2) target bundleno = 10 (0xa), region = 81 }
 0x29b   : > { %s1497_s17 = smov %s1491_s26 }
 0x2a0   :  { %631 = vsyncpa [#allocation3], 1 }
 0x2a1   :  { %633 = vsyncpa [#allocation3 + $0x1], 1 }
 0x2a2   :  { %634 = vsyncpa [#allocation6], 1 }
 0x2a3   :  { %635 = vsyncpa [#allocation4], 1 }
 0x2a4   :  { %637 = vsyncpa [#allocation4 + $0x1], 1 }

</bundles_post_ra>
